<compile_context>
chip_gen: v5e
topology: v5e:2x2
jax: 0.10.0
libtpu: 0.0.40
codegen_flags: <defaults>
</compile_context>

<pallas_src>
import jax
import jax.numpy as jnp
from jax.experimental import pallas as pl
from jax.experimental.pallas import tpu as pltpu

NEG_SLOPE = 0.01   # nn.LeakyReLU default negative_slope
BN_EPS = 1e-5      # nn.BatchNorm2d default eps


# ----------------------------------------------------------------------------
# Fused kernel: conv-as-matmul + bias + BatchNorm(train) + LeakyReLU
# ----------------------------------------------------------------------------
def _fused_conv_bn_lrelu_kernel(p_ref, w_ref, b_ref, g_ref, be_ref, o_ref):
    """p_ref : (Kp, NHW)    im2col patch matrix (K zero-padded to mult of 8)
       w_ref : (Cout, Kp)   2-D conv weights (tap-major, cin-minor on K)
       b_ref : (Cout, 1)    conv bias
       g_ref : (Cout, 1)    BN gamma
       be_ref: (Cout, 1)    BN beta
       o_ref : (Cout, NHW)  output (lane-dense store)
    """
    # Single fat MXU matmul instead of KH*KW matmuls of K=Cin.
    acc = jnp.dot(w_ref[...], p_ref[...], preferred_element_type=jnp.float32)
    acc = acc + b_ref[...]                                  # conv bias

    # BatchNorm2d training mode: biased batch statistics over (N, H, W),
    # i.e. over the lane axis of the (Cout, N*H*W) accumulator.
    mean = jnp.mean(acc, axis=1, keepdims=True)             # (Cout, 1)
    cen = acc - mean
    var = jnp.mean(cen * cen, axis=1, keepdims=True)        # biased variance
    scale = g_ref[...] * jax.lax.rsqrt(var + BN_EPS)        # (Cout, 1)
    y = cen * scale + be_ref[...]

    # LeakyReLU
    y = jnp.where(y >= 0, y, NEG_SLOPE * y)
    o_ref[...] = y.astype(o_ref.dtype)


# ----------------------------------------------------------------------------
# Wrapper: NCHW in / NCHW out; circular pad + im2col as one-time XLA glue.
# ----------------------------------------------------------------------------
def simple_net_forward(x_nchw, params):
    w, b = params["w"], params["b"]
    gamma, beta = params["gamma"], params["beta"]
    N, Cin, H, W = x_nchw.shape
    Cout, _, KH, KW = w.shape
    ph, pw = KH // 2, KW // 2
    K = KH * KW * Cin
    Kp = ((K + 7) // 8) * 8          # pad K to sublane multiple (zero rows)
    NHW = N * H * W

    x = x_nchw.astype(jnp.float32)

    # --- boundary glue (one small XLA fusion): circular pad + im2col --------
    x_t = jnp.transpose(x, (1, 0, 2, 3))                          # (Cin,N,H,W)
    x_p = jnp.pad(x_t, ((0, 0), (0, 0), (ph, ph), (pw, pw)), mode="wrap")
    taps = [x_p[:, :, kh:kh + H, kw:kw + W]
            for kh in range(KH) for kw in range(KW)]              # KH*KW taps
    patches = jnp.stack(taps, axis=0).reshape(K, NHW)             # (K, N*H*W)
    # weight index order on K must match patches: (kh, kw, cin)
    w2d = jnp.transpose(w, (0, 2, 3, 1)).reshape(Cout, K)         # (Cout, K)

    if Kp != K:  # zero-pad the contraction dim -> aligned, matmul unchanged
        patches = jnp.pad(patches, ((0, Kp - K), (0, 0)))
        w2d = jnp.pad(w2d, ((0, 0), (0, Kp - K)))

    out2d = pl.pallas_call(
        _fused_conv_bn_lrelu_kernel,
        out_shape=jax.ShapeDtypeStruct((Cout, NHW), jnp.float32),
        grid=(1,),
        in_specs=[
            pl.BlockSpec((Kp, NHW), lambda i: (0, 0)),
            pl.BlockSpec((Cout, Kp), lambda i: (0, 0)),
            pl.BlockSpec((Cout, 1), lambda i: (0, 0)),
            pl.BlockSpec((Cout, 1), lambda i: (0, 0)),
            pl.BlockSpec((Cout, 1), lambda i: (0, 0)),
        ],
        out_specs=pl.BlockSpec((Cout, NHW), lambda i: (0, 0)),
        compiler_params=pltpu.CompilerParams(
            dimension_semantics=("arbitrary",)),
    )(patches, w2d, b.reshape(Cout, 1), gamma.reshape(Cout, 1),
      beta.reshape(Cout, 1))

    # (Cout, N*H*W) -> (N, Cout, H, W)
    return jnp.transpose(out2d.reshape(Cout, N, H, W), (1, 0, 2, 3))


# ----------------------------------------------------------------------------
# Deterministic synthetic parameters (PyTorch-like init)
# ----------------------------------------------------------------------------
def init_params(key, in_ch, out_ch, ks):
    k_w, k_b = jax.random.split(key)
    fan_in = in_ch * ks * ks
    bound = 1.0 / float(fan_in) ** 0.5
    w = jax.random.uniform(k_w, (out_ch, in_ch, ks, ks), jnp.float32,
                           -bound, bound)
    b = jax.random.uniform(k_b, (out_ch,), jnp.float32, -bound, bound)
    return {
        "w": w, "b": b,
        "gamma": jnp.ones((out_ch,), jnp.float32),   # BN weight init
        "beta": jnp.zeros((out_ch,), jnp.float32),   # BN bias init
    }


# ----------------------------------------------------------------------------
# Pure-JAX reference (for in-script correctness check)
# ----------------------------------------------------------------------------
def simple_net_reference(x_nchw, params):
    w, b = params["w"], params["b"]
    gamma, beta = params["gamma"], params["beta"]
    ks = w.shape[-1]
    p = ks // 2
    xp = jnp.pad(x_nchw, ((0, 0), (0, 0), (p, p), (p, p)), mode="wrap")
    y = jax.lax.conv_general_dilated(
        xp, w, window_strides=(1, 1), padding="VALID",
        dimension_numbers=("NCHW", "OIHW", "NCHW"),
        precision=jax.lax.Precision.HIGHEST)
    y = y + b[None, :, None, None]
    mean = jnp.mean(y, axis=(0, 2, 3), keepdims=True)
    var = jnp.mean((y - mean) ** 2, axis=(0, 2, 3), keepdims=True)
    y = (y - mean) * (gamma[None, :, None, None] * jax.lax.rsqrt(var + BN_EPS))
    y = y + beta[None, :, None, None]
    return jnp.where(y >= 0, y, NEG_SLOPE * y)


if __name__ == "__main__":
    # Small config consistent with the module signature.
    N, Cin, H, W = 2, 4, 16, 16
    Cout, ks = 32, 3

    key = jax.random.PRNGKey(0)
    k_x, k_p = jax.random.split(key)
    x = jax.random.normal(k_x, (N, Cin, H, W), jnp.float32)   # NCHW input
    params = init_params(k_p, Cin, Cout, ks)

    fwd = jax.jit(simple_net_forward)
    out = fwd(x, params)
    jax.block_until_ready(out)

    assert out.shape == (N, Cout, H, W)
    assert bool(jnp.all(jnp.isfinite(out)))

    ref = simple_net_reference(x, params)
    assert float(jnp.max(jnp.abs(out - ref))) < 1e-2

    print("KERNEL_OK")
</pallas_src>

<mosaic_0001>
module attributes {stable_mosaic.version = 11 : i64} {
  func.func @_fused_conv_bn_lrelu_kernel(%arg0: i32, %arg1: memref<40x512xf32, #tpu.memory_space<vmem>>, %arg2: memref<32x40xf32, #tpu.memory_space<vmem>>, %arg3: memref<32x1xf32, #tpu.memory_space<vmem>>, %arg4: memref<32x1xf32, #tpu.memory_space<vmem>>, %arg5: memref<32x1xf32, #tpu.memory_space<vmem>>, %arg6: memref<32x512xf32, #tpu.memory_space<vmem>>) attributes {dimension_semantics = [#tpu.dimension_semantics<arbitrary>], iteration_bounds = array<i64: 1>, scalar_prefetch = 0 : i64, scratch_operands = 0 : i64, tpu.core_type = #tpu.core_type<tc>, window_params = [{pipeline_mode = #tpu.pipeline_mode<synchronous>, transform_indices = @transform_0, window_bounds = array<i64: 40, 512>}, {pipeline_mode = #tpu.pipeline_mode<synchronous>, transform_indices = @transform_1, window_bounds = array<i64: 32, 40>}, {pipeline_mode = #tpu.pipeline_mode<synchronous>, transform_indices = @transform_2, window_bounds = array<i64: 32, 1>}, {pipeline_mode = #tpu.pipeline_mode<synchronous>, transform_indices = @transform_3, window_bounds = array<i64: 32, 1>}, {pipeline_mode = #tpu.pipeline_mode<synchronous>, transform_indices = @transform_4, window_bounds = array<i64: 32, 1>}, {pipeline_mode = #tpu.pipeline_mode<synchronous>, transform_indices = @transform_5, window_bounds = array<i64: 32, 512>}]} {
    %c0 = arith.constant 0 : index
    %c0_0 = arith.constant 0 : index
    %0 = vector.load %arg2[%c0, %c0_0] : memref<32x40xf32, #tpu.memory_space<vmem>>, vector<32x40xf32>
    %c0_1 = arith.constant 0 : index
    %c0_2 = arith.constant 0 : index
    %1 = vector.load %arg1[%c0_1, %c0_2] : memref<40x512xf32, #tpu.memory_space<vmem>>, vector<40x512xf32>
    %cst = arith.constant dense<0.000000e+00> : vector<32x512xf32>
    %2 = tpu.matmul %0, %1, %cst {dimension_numbers = #tpu.dot_dimension_numbers<[1], [0], [0], [1], [0, 0, 1, 1], [], []>} : vector<32x40xf32>, vector<40x512xf32>, vector<32x512xf32> -> vector<32x512xf32>
    %c0_3 = arith.constant 0 : index
    %c0_4 = arith.constant 0 : index
    %3 = vector.load %arg3[%c0_3, %c0_4] : memref<32x1xf32, #tpu.memory_space<vmem>>, vector<32x1xf32>
    %4 = vector.broadcast %3 : vector<32x1xf32> to vector<32x512xf32>
    %5 = arith.addf %2, %4 : vector<32x512xf32>
    %cst_5 = arith.constant dense<0.000000e+00> : vector<32xf32>
    %6 = vector.multi_reduction <add>, %5, %cst_5 [1] : vector<32x512xf32> to vector<32xf32>
    %7 = vector.shape_cast %6 : vector<32xf32> to vector<32x1xf32>
    %cst_6 = arith.constant 5.120000e+02 : f32
    %8 = vector.broadcast %cst_6 : f32 to vector<32x1xf32>
    %9 = arith.divf %7, %8 : vector<32x1xf32>
    %10 = vector.broadcast %9 : vector<32x1xf32> to vector<32x512xf32>
    %11 = arith.subf %5, %10 : vector<32x512xf32>
    %12 = arith.mulf %11, %11 : vector<32x512xf32>
    %cst_7 = arith.constant dense<0.000000e+00> : vector<32xf32>
    %13 = vector.multi_reduction <add>, %12, %cst_7 [1] : vector<32x512xf32> to vector<32xf32>
    %14 = vector.shape_cast %13 : vector<32xf32> to vector<32x1xf32>
    %cst_8 = arith.constant 5.120000e+02 : f32
    %15 = vector.broadcast %cst_8 : f32 to vector<32x1xf32>
    %16 = arith.divf %14, %15 : vector<32x1xf32>
    %c0_9 = arith.constant 0 : index
    %c0_10 = arith.constant 0 : index
    %17 = vector.load %arg4[%c0_9, %c0_10] : memref<32x1xf32, #tpu.memory_space<vmem>>, vector<32x1xf32>
    %cst_11 = arith.constant 9.99999974E-6 : f32
    %18 = vector.broadcast %cst_11 : f32 to vector<32x1xf32>
    %19 = arith.addf %16, %18 : vector<32x1xf32>
    %20 = math.rsqrt %19 : vector<32x1xf32>
    %21 = arith.mulf %17, %20 : vector<32x1xf32>
    %22 = vector.broadcast %21 : vector<32x1xf32> to vector<32x512xf32>
    %23 = arith.mulf %11, %22 : vector<32x512xf32>
    %c0_12 = arith.constant 0 : index
    %c0_13 = arith.constant 0 : index
    %24 = vector.load %arg5[%c0_12, %c0_13] : memref<32x1xf32, #tpu.memory_space<vmem>>, vector<32x1xf32>
    %25 = vector.broadcast %24 : vector<32x1xf32> to vector<32x512xf32>
    %26 = arith.addf %23, %25 : vector<32x512xf32>
    %cst_14 = arith.constant 0.000000e+00 : f32
    %27 = vector.broadcast %cst_14 : f32 to vector<32x512xf32>
    %28 = arith.cmpf oge, %26, %27 : vector<32x512xf32>
    %cst_15 = arith.constant 0.00999999977 : f32
    %29 = vector.broadcast %cst_15 : f32 to vector<32x512xf32>
    %30 = arith.mulf %29, %26 : vector<32x512xf32>
    %31 = arith.select %28, %26, %30 : vector<32x512xi1>, vector<32x512xf32>
    %c0_16 = arith.constant 0 : index
    %c0_17 = arith.constant 0 : index
    %32 = vector.load %arg6[%c0_16, %c0_17] : memref<32x512xf32, #tpu.memory_space<vmem>>, vector<32x512xf32>
    tpu.vector_store %arg6[%c0_16, %c0_17], %31 {strides = array<i32>} : memref<32x512xf32, #tpu.memory_space<vmem>>, vector<32x512xf32>,
    return
  }
  func.func @transform_0(%arg0: i32) -> (i32, i32) {
    %c0_i32 = arith.constant 0 : i32
    %c0_i32_0 = arith.constant 0 : i32
    %c0_i32_1 = arith.constant 0 : i32
    return %c0_i32, %c0_i32_0 : i32, i32
  }
  func.func @transform_1(%arg0: i32) -> (i32, i32) {
    %c0_i32 = arith.constant 0 : i32
    %c0_i32_0 = arith.constant 0 : i32
    %c0_i32_1 = arith.constant 0 : i32
    return %c0_i32, %c0_i32_0 : i32, i32
  }
  func.func @transform_2(%arg0: i32) -> (i32, i32) {
    %c0_i32 = arith.constant 0 : i32
    %c0_i32_0 = arith.constant 0 : i32
    %c0_i32_1 = arith.constant 0 : i32
    return %c0_i32, %c0_i32_0 : i32, i32
  }
  func.func @transform_3(%arg0: i32) -> (i32, i32) {
    %c0_i32 = arith.constant 0 : i32
    %c0_i32_0 = arith.constant 0 : i32
    %c0_i32_1 = arith.constant 0 : i32
    return %c0_i32, %c0_i32_0 : i32, i32
  }
  func.func @transform_4(%arg0: i32) -> (i32, i32) {
    %c0_i32 = arith.constant 0 : i32
    %c0_i32_0 = arith.constant 0 : i32
    %c0_i32_1 = arith.constant 0 : i32
    return %c0_i32, %c0_i32_0 : i32, i32
  }
  func.func @transform_5(%arg0: i32) -> (i32, i32) {
    %c0_i32 = arith.constant 0 : i32
    %c0_i32_0 = arith.constant 0 : i32
    %c0_i32_1 = arith.constant 0 : i32
    return %c0_i32, %c0_i32_0 : i32, i32
  }
}

</mosaic_0001>

<bundles_post_ra>
// kernel: simple_net_forward.1
= control target key start
LH: loop header
LB: loop body
LE: loop exit
PB: predicated region body
PF: predicated region fallthrough
CT: control target
= control target key end

     0   :  { %v511_v3 = vmov 0   ;;  %vm68_vm0 = vcmask 326656   ;;  %s837_s0 = inlined_call_operand.vmem [shape: f32[40,512], index: 0, kind: input, shape index: {}]   ;;  %s838_s1 = inlined_call_operand.vmem [shape: f32[32,40], index: 1, kind: input, shape index: {}]   ;;  %s839_s2 = inlined_call_operand.vmem [shape: f32[32,1], index: 2, kind: input, shape index: {}]   ;;  %s840_s4 = inlined_call_operand.vmem [shape: f32[32,1], index: 4, kind: input, shape index: {}]   ;;  %s841_s3 = inlined_call_operand.vmem [shape: f32[32,1], index: 3, kind: input, shape index: {}]   ;;  %s842_s5 = inlined_call_operand.vmem [shape: f32[32,512], index: 5, kind: output, shape index: {}]  }
   0x1   :  { %v40_v0 = vld [vmem:[%s837_s0 + $0x80] sm:$0xff]  ;;  %v41_v1 = vld [vmem:[%s837_s0 + $0x88] sm:$0xff]  ;;  %v42_v2 = vld [vmem:[%s837_s0 + $0x90] sm:$0xff]  ;;  %498 = vset.pattern.permute.xlu0 %v511_v3  ;;  %499 = vset.pattern.permute.xlu1 %v511_v3 }
   0x2   :  { %92 = vmatpush.msra.mxu0 %v40_v0  ;;  %121 = vmatpush.msra.mxu1 %v41_v1  ;;  %v43_v4 = vld [vmem:[%s837_s0 + $0x98] sm:$0xff]  ;;  %v36_v5 = vld [vmem:[%s837_s0 + $0x60] sm:$0xff]  ;;  %v37_v6 = vld [vmem:[%s837_s0 + $0x68] sm:$0xff] }
   0x3   :  { %150 = vmatpush.msra.mxu2 %v42_v2  ;;  %179 = vmatpush.msra.mxu3 %v43_v4  ;;  %v38_v7 = vld [vmem:[%s837_s0 + $0x70] sm:$0xff]  ;;  %v39_v8 = vld [vmem:[%s837_s0 + $0x78] sm:$0xff]  ;;  %v32_v9 = vld [vmem:[%s837_s0 + $0x40] sm:$0xff] }
   0x4   :  { %93 = vmatpush.msra.mxu0 %v36_v5  ;;  %122 = vmatpush.msra.mxu1 %v37_v6  ;;  %v33_v10 = vld [vmem:[%s837_s0 + $0x48] sm:$0xff]  ;;  %v34_v11 = vld [vmem:[%s837_s0 + $0x50] sm:$0xff]  ;;  %v35_v12 = vld [vmem:[%s837_s0 + $0x58] sm:$0xff] }
   0x5   :  { %151 = vmatpush.msra.mxu2 %v38_v7  ;;  %180 = vmatpush.msra.mxu3 %v39_v8  ;;  %v28_v13 = vld [vmem:[%s837_s0 + $0x20] sm:$0xff]  ;;  %v29_v14 = vld [vmem:[%s837_s0 + $0x28] sm:$0xff]  ;;  %v30_v15 = vld [vmem:[%s837_s0 + $0x30] sm:$0xff] }
   0x6   :  { %94 = vmatpush.msra.mxu0 %v32_v9  ;;  %123 = vmatpush.msra.mxu1 %v33_v10  ;;  %v31_v16 = vld [vmem:[%s837_s0 + $0x38] sm:$0xff]  ;;  %v24_v17 = vld [vmem:[%s837_s0] sm:$0xff]  ;;  %v25_v18 = vld [vmem:[%s837_s0 + $0x8] sm:$0xff] }
   0x7   :  { %152 = vmatpush.msra.mxu2 %v34_v11  ;;  %181 = vmatpush.msra.mxu3 %v35_v12  ;;  %v26_v19 = vld [vmem:[%s837_s0 + $0x10] sm:$0xff]  ;;  %v27_v20 = vld [vmem:[%s837_s0 + $0x18] sm:$0xff]  ;;  %v20_v21 = vld [vmem:[%s838_s1] sm:$0xff] }
   0x8   :  { %95 = vmatpush.msra.mxu0 %v28_v13  ;;  %124 = vmatpush.msra.mxu1 %v29_v14  ;;  %v44_v22 = vld [vmem:[%s839_s2] sm:$0xff]  ;;  %v46_v23 = vld [vmem:[%s839_s2 + $0x10] sm:$0xff]  ;;  %v21_v24 = vld [vmem:[%s838_s1 + $0x8] sm:$0xff]  ;;  %v512_v14 = vmov 512.0  }
   0x9   :  { %153 = vmatpush.msra.mxu2 %v30_v15  ;;  %182 = vmatpush.msra.mxu3 %v31_v16  ;;  %v45_v25 = vld [vmem:[%s839_s2 + $0x8] sm:$0xff]  ;;  %v47_v26 = vld [vmem:[%s839_s2 + $0x18] sm:$0xff]  ;;  %v22_v27 = vld [vmem:[%s838_s1 + $0x10] sm:$0xff]  ;;  %501 = vrcp.f32 %v512_v14 }
   0xa   :  { %96 = vmatpush.msra.mxu0 %v24_v17  ;;  %125 = vmatpush.msra.mxu1 %v25_v18  ;;  %v23_v28 = vld [vmem:[%s838_s1 + $0x18] sm:$0xff]  ;;  %v372_v13 = vld [vmem:[%s840_s4] sm:$0xff] }
   0xb   :  { %154 = vmatpush.msra.mxu2 %v26_v19  ;;  %183 = vmatpush.msra.mxu3 %v27_v20 }
   0xc   :  { %480 = vmatmul.msk.f32.vlgmr.msra.gmra.mxu0 %vm68_vm0, %v20_v21  ;;  %484 = vmatmul.msk.f32.vlgmr.msra.gmra.mxu1 %vm68_vm0, %v20_v21 }
   0xd   :  { %488 = vmatmul.msk.f32.vlgmr.msra.gmra.mxu2 %vm68_vm0, %v20_v21  ;;  %492 = vmatmul.msk.f32.vlgmr.msra.gmra.mxu3 %vm68_vm0, %v20_v21 }
   0xe   :  { %50 = vperm.xlu0 %498, %v44_v22   ;;  %60 = vperm.xlu1 %499, %v46_v23  }
   0xf   :  { %500 = vset.pattern.permute.xlu2 %v511_v3  ;;  %v502_v15 = vpop.eup %501 }
  0x10   :  { %v218_v16 = vmul.f32 512.0, %v502_v15  ;;  %vm222_vm1 = vweird.f32 %v502_v15 }
  0x12   :  { %v219_v17 = vsub.f32 1.0, %v218_v16 }
  0x14   :  { %481 = vmatmul.msk.f32.gmra.mxu0 %vm68_vm0, %v21_v24  ;;  %485 = vmatmul.msk.f32.gmra.mxu1 %vm68_vm0, %v21_v24  ;;  %v220_v18 = vmul.f32 %v502_v15, %v219_v17 }
  0x15   :  { %489 = vmatmul.msk.f32.gmra.mxu2 %vm68_vm0, %v21_v24  ;;  %493 = vmatmul.msk.f32.gmra.mxu3 %vm68_vm0, %v21_v24 }
  0x16   :  { %55 = vperm.xlu0 %498, %v45_v25   ;;  %65 = vperm.xlu1 %499, %v47_v26   ;;  %v221_v19 = vadd.f32 %v502_v15, %v220_v18 }
  0x18   :  { %v670_v20 = vsel %vm222_vm1, %v502_v15, %v221_v19 }
  0x1c   :  { %482 = vmatmul.msk.f32.gmra.mxu0 %vm68_vm0, %v22_v27  ;;  %486 = vmatmul.msk.f32.gmra.mxu1 %vm68_vm0, %v22_v27 }
  0x1d   :  { %490 = vmatmul.msk.f32.gmra.mxu2 %vm68_vm0, %v22_v27  ;;  %494 = vmatmul.msk.f32.gmra.mxu3 %vm68_vm0, %v22_v27 }
  0x24   :  { %483 = vmatmul.msk.f32.gmra.mxu0 %vm68_vm0, %v23_v28  ;;  %487 = vmatmul.msk.f32.gmra.mxu1 %vm68_vm0, %v23_v28 }
  0x25   :  { %491 = vmatmul.msk.f32.gmra.mxu2 %vm68_vm0, %v23_v28  ;;  %495 = vmatmul.msk.f32.gmra.mxu3 %vm68_vm0, %v23_v28 }
  0x80   :  { %v51_v31 = vpop.permute.xlu0 %50  ;;  %v61_v52 = vpop.permute.xlu1 %60 }
  0x88   :  { %v56_v42 = vpop.permute.xlu0 %55  ;;  %v66_v2 = vpop.permute.xlu1 %65 }
  0x89   :  { %v98_v29 = vpop.f32.mrf.mxu0  ;;  %v127_v30 = vpop.f32.mrf.mxu1 }
  0x8a   :  { %v643_v32 = vadd.f32 %v98_v29, %v51_v31  ;;  %v645_v33 = vadd.f32 %v127_v30, %v51_v31 }
  0x8c   :  { %v197_v34 = vadd.f32 %v645_v33, %v643_v32 }
  0x90   :  { %v156_v35 = vpop.f32.mrf.mxu2  ;;  %v185_v36 = vpop.f32.mrf.mxu3 }
  0x91   :  { %v157_v37 = vadd.f32 %v156_v35, %v51_v31  ;;  %v101_v38 = vpop.f32.mrf.mxu0  ;;  %v130_v39 = vpop.f32.mrf.mxu1  ;;  %v186_v40 = vadd.f32 %v185_v36, %v51_v31 }
  0x92   :  { %v649_v43 = vadd.f32 %v101_v38, %v56_v42  ;;  %v651_v44 = vadd.f32 %v130_v39, %v56_v42 }
  0x93   :  { %v198_v41 = vadd.f32 %v197_v34, %v157_v37 }
  0x94   :  { %v202_v48 = vadd.f32 %v651_v44, %v649_v43 }
  0x95   :  { %v199_v45 = vadd.f32 %v198_v41, %v186_v40 }
  0x97   :  { %200 = vadd.xlane.f32.xlu2 %v199_v45 }
  0x98   :  { %v159_v46 = vpop.f32.mrf.mxu2  ;;  %v188_v47 = vpop.f32.mrf.mxu3 }
  0x99   :  { %v160_v49 = vadd.f32 %v159_v46, %v56_v42  ;;  %v104_v50 = vpop.f32.mrf.mxu0  ;;  %v133_v51 = vpop.f32.mrf.mxu1  ;;  %v189_v54 = vadd.f32 %v188_v47, %v56_v42 }
  0x9a   :  { %v655_v55 = vadd.f32 %v104_v50, %v61_v52  ;;  %v657_v56 = vadd.f32 %v133_v51, %v61_v52 }
  0x9b   :  { %v203_v53 = vadd.f32 %v202_v48, %v160_v49 }
  0x9c   :  { %v207_v58 = vadd.f32 %v657_v56, %v655_v55 }
  0x9d   :  { %v204_v57 = vadd.f32 %v203_v53, %v189_v54 }
  0x9f   :  { %205 = vadd.xlane.f32.xlu2 %v204_v57 }
  0xa0   :  { %v162_v59 = vpop.f32.mrf.mxu2  ;;  %v191_v60 = vpop.f32.mrf.mxu3 }
  0xa1   :  { %v163_v61 = vadd.f32 %v162_v59, %v61_v52  ;;  %v107_v62 = vpop.f32.mrf.mxu0  ;;  %v136_v63 = vpop.f32.mrf.mxu1  ;;  %v192_v1 = vadd.f32 %v191_v60, %v61_v52 }
  0xa2   :  { %v661_v3 = vadd.f32 %v107_v62, %v66_v2  ;;  %v663_v4 = vadd.f32 %v136_v63, %v66_v2 }
  0xa3   :  { %v208_v0 = vadd.f32 %v207_v58, %v163_v61 }
  0xa4   :  { %v212_v8 = vadd.f32 %v663_v4, %v661_v3 }
  0xa5   :  { %v209_v5 = vadd.f32 %v208_v0, %v192_v1 }
  0xa7   :  { %210 = vadd.xlane.f32.xlu0 %v209_v5 }
  0xa8   :  { %v165_v6 = vpop.f32.mrf.mxu2  ;;  %v194_v7 = vpop.f32.mrf.mxu3 }
  0xa9   :  { %v166_v9 = vadd.f32 %v165_v6, %v66_v2  ;;  %v195_v11 = vadd.f32 %v194_v7, %v66_v2 }
  0xab   :  { %v213_v10 = vadd.f32 %v212_v8, %v166_v9 }
  0xad   :  { %v214_v12 = vadd.f32 %v213_v10, %v195_v11 }
  0xaf   :  { %215 = vadd.xlane.f32.xlu1 %v214_v12 }
  0xbb   :  { %378 = vperm.xlu0 %498, %v372_v13  }
 0x10a   :  { %v201_v21 = vpop.xlane.xlu2 %200 }
 0x10b   :  { %v224_v22 = vmul.f32 %v670_v20, %v201_v21 }
 0x10d   :  { %v674_v23 = vsub.f32 %v643_v32, %v224_v22  ;;  %v677_v24 = vsub.f32 %v645_v33, %v224_v22  ;;  %v679_v25 = vsub.f32 %v157_v37, %v224_v22  ;;  %v681_v26 = vsub.f32 %v186_v40, %v224_v22 }
 0x10f   :  { %v244_v27 = vmul.f32 %v674_v23, %v674_v23  ;;  %v245_v28 = vmul.f32 %v677_v24, %v677_v24  ;;  %v246_v29 = vmul.f32 %v679_v25, %v679_v25  ;;  %v247_v33 = vmul.f32 %v681_v26, %v681_v26 }
 0x111   :  { %v260_v30 = vadd.f32 %v245_v28, %v244_v27 }
 0x112   :  { %v206_v31 = vpop.xlane.xlu2 %205 }
 0x113   :  { %v225_v32 = vmul.f32 %v670_v20, %v206_v31  ;;  %v261_v34 = vadd.f32 %v260_v30, %v246_v29  ;;  %v284_v30 = vld [vmem:[%s841_s3] sm:$0xff] }
 0x115   :  { %v693_v35 = vsub.f32 %v649_v43, %v225_v32  ;;  %v696_v36 = vsub.f32 %v651_v44, %v225_v32  ;;  %v262_v37 = vadd.f32 %v261_v34, %v247_v33  ;;  %v698_v38 = vsub.f32 %v160_v49, %v225_v32 }
 0x116   :  { %v700_v39 = vsub.f32 %v189_v54, %v225_v32 }
 0x117   :  { %263 = vadd.xlane.f32.xlu2 %v262_v37  ;;  %v248_v40 = vmul.f32 %v693_v35, %v693_v35  ;;  %v249_v41 = vmul.f32 %v696_v36, %v696_v36  ;;  %v250_v42 = vmul.f32 %v698_v38, %v698_v38 }
 0x118   :  { %v251_v46 = vmul.f32 %v700_v39, %v700_v39 }
 0x119   :  { %v265_v43 = vadd.f32 %v249_v41, %v248_v40 }
 0x11a   :  { %v211_v45 = vpop.xlane.xlu0 %210 }
 0x11b   :  { %v226_v44 = vmul.f32 %v670_v20, %v211_v45  ;;  %v266_v47 = vadd.f32 %v265_v43, %v250_v42 }
 0x11d   :  { %v712_v48 = vsub.f32 %v655_v55, %v226_v44  ;;  %v715_v49 = vsub.f32 %v657_v56, %v226_v44  ;;  %v267_v50 = vadd.f32 %v266_v47, %v251_v46  ;;  %v717_v51 = vsub.f32 %v163_v61, %v226_v44  ;;  %v285_v46 = vld [vmem:[%s841_s3 + $0x8] sm:$0xff] }
 0x11e   :  { %v719_v52 = vsub.f32 %v192_v1, %v226_v44 }
 0x11f   :  { %268 = vadd.xlane.f32.xlu2 %v267_v50  ;;  %v252_v53 = vmul.f32 %v712_v48, %v712_v48  ;;  %v253_v54 = vmul.f32 %v715_v49, %v715_v49  ;;  %v254_v57 = vmul.f32 %v717_v51, %v717_v51 }
 0x120   :  { %v255_v59 = vmul.f32 %v719_v52, %v719_v52 }
 0x121   :  { %v270_v55 = vadd.f32 %v253_v54, %v252_v53 }
 0x122   :  { %v216_v58 = vpop.xlane.xlu1 %215 }
 0x123   :  { %v227_v56 = vmul.f32 %v670_v20, %v216_v58  ;;  %v271_v60 = vadd.f32 %v270_v55, %v254_v57 }
 0x125   :  { %v731_v61 = vsub.f32 %v661_v3, %v227_v56  ;;  %v734_v62 = vsub.f32 %v663_v4, %v227_v56  ;;  %v272_v63 = vadd.f32 %v271_v60, %v255_v59  ;;  %v736_v0 = vsub.f32 %v166_v9, %v227_v56 }
 0x126   :  { %v738_v1 = vsub.f32 %v195_v11, %v227_v56  ;;  %v286_v56 = vld [vmem:[%s841_s3 + $0x10] sm:$0xff] }
 0x127   :  { %273 = vadd.xlane.f32.xlu2 %v272_v63  ;;  %v256_v2 = vmul.f32 %v731_v61, %v731_v61  ;;  %v257_v5 = vmul.f32 %v734_v62, %v734_v62  ;;  %v258_v6 = vmul.f32 %v736_v0, %v736_v0  ;;  %v375_v63 = vld [vmem:[%s840_s4 + $0x18] sm:$0xff] }
 0x128   :  { %v259_v4 = vmul.f32 %v738_v1, %v738_v1 }
 0x129   :  { %v275_v3 = vadd.f32 %v257_v5, %v256_v2 }
 0x12b   :  { %v276_v7 = vadd.f32 %v275_v3, %v258_v6 }
 0x12d   :  { %v277_v8 = vadd.f32 %v276_v7, %v259_v4  ;;  %v287_v4 = vld [vmem:[%s841_s3 + $0x18] sm:$0xff] }
 0x12f   :  { %278 = vadd.xlane.f32.xlu2 %v277_v8  ;;  %v374_v8 = vld [vmem:[%s840_s4 + $0x10] sm:$0xff] }
 0x18a   :  { %v264_v9 = vpop.xlane.xlu2 %263 }
 0x18b   :  { %v280_v10 = vmul.f32 %v264_v9, %v670_v20 }
 0x18d   :  { %v288_v11 = vadd.f32 1e-05, %v280_v10 }
 0x18f   :  { %503 = vrsqrt.f32 %v288_v11  ;;  %vm298_vm3 = vweird.f32 %v288_v11 }
 0x192   :  { %v269_v12 = vpop.xlane.xlu2 %268 }
 0x193   :  { %v281_v13 = vmul.f32 %v269_v12, %v670_v20 }
 0x195   :  { %v504_v14 = vpop.eup %503  ;;  %v289_v15 = vadd.f32 1e-05, %v281_v13 }
 0x196   :  { %v293_v16 = vmul.f32 %v504_v14, %v288_v11  ;;  %vm299_vm2 = vweird.f32 %v504_v14  ;;  %v373_v11 = vld [vmem:[%s840_s4 + $0x8] sm:$0xff] }
 0x197   :  { %505 = vrsqrt.f32 %v289_v15  ;;  %vm300_vm4 = vmor %vm298_vm3, %vm299_vm2  ;;  %vm308_vm6 = vweird.f32 %v289_v15 }
 0x198   :  { %v294_v17 = vmul.f32 %v504_v14, %v293_v16 }
 0x19a   :  { %v295_v18 = vmul.f32 0.5, %v294_v17  ;;  %v274_v19 = vpop.xlane.xlu2 %273  ;;  %v379_v17 = vpop.permute.xlu0 %378 }
 0x19b   :  { %v282_v21 = vmul.f32 %v274_v19, %v670_v20 }
 0x19c   :  { %v296_v22 = vsub.f32 1.5, %v295_v18 }
 0x19d   :  { %v506_v27 = vpop.eup %505  ;;  %v290_v28 = vadd.f32 1e-05, %v282_v21 }
 0x19e   :  { %v303_v29 = vmul.f32 %v506_v27, %v289_v15  ;;  %v297_v31 = vmul.f32 %v504_v14, %v296_v22  ;;  %vm309_vm5 = vweird.f32 %v506_v27 }
 0x19f   :  { %507 = vrsqrt.f32 %v290_v28  ;;  %vm310_vm7 = vmor %vm308_vm6, %vm309_vm5  ;;  %vm318_vm9 = vweird.f32 %v290_v28 }
 0x1a0   :  { %v304_v32 = vmul.f32 %v506_v27, %v303_v29  ;;  %v301_v33 = vsel %vm300_vm4, %v504_v14, %v297_v31 }
 0x1a1   :  { %v332_v34 = vmul.f32 %v301_v33, %v284_v30 }
 0x1a2   :  { %v305_v37 = vmul.f32 0.5, %v304_v32  ;;  %v279_v40 = vpop.xlane.xlu2 %278 }
 0x1a3   :  { %v283_v41 = vmul.f32 %v279_v40, %v670_v20  ;;  %338 = vperm.xlu2 %500, %v332_v34  }
 0x1a4   :  { %v306_v42 = vsub.f32 1.5, %v305_v37 }
 0x1a5   :  { %v508_v43 = vpop.eup %507  ;;  %v291_v45 = vadd.f32 1e-05, %v283_v41 }
 0x1a6   :  { %v313_v44 = vmul.f32 %v508_v43, %v290_v28  ;;  %v307_v47 = vmul.f32 %v506_v27, %v306_v42  ;;  %vm319_vm8 = vweird.f32 %v508_v43 }
 0x1a7   :  { %509 = vrsqrt.f32 %v291_v45  ;;  %vm320_vm10 = vmor %vm318_vm9, %vm319_vm8  ;;  %vm328_vm12 = vweird.f32 %v291_v45 }
 0x1a8   :  { %v314_v50 = vmul.f32 %v508_v43, %v313_v44  ;;  %v311_v53 = vsel %vm310_vm7, %v506_v27, %v307_v47 }
 0x1a9   :  { %v333_v54 = vmul.f32 %v311_v53, %v285_v46 }
 0x1aa   :  { %v315_v57 = vmul.f32 0.5, %v314_v50 }
 0x1ab   :  { %343 = vperm.xlu0 %498, %v333_v54  }
 0x1ac   :  { %v316_v20 = vsub.f32 1.5, %v315_v57 }
 0x1ad   :  { %v510_v55 = vpop.eup %509 }
 0x1ae   :  { %v323_v58 = vmul.f32 %v510_v55, %v291_v45  ;;  %v317_v59 = vmul.f32 %v508_v43, %v316_v20  ;;  %vm329_vm11 = vweird.f32 %v510_v55 }
 0x1af   :  { %vm330_vm13 = vmor %vm328_vm12, %vm329_vm11 }
 0x1b0   :  { %v324_v60 = vmul.f32 %v510_v55, %v323_v58  ;;  %v321_v2 = vsel %vm320_vm10, %v508_v43, %v317_v59 }
 0x1b1   :  { %v334_v5 = vmul.f32 %v321_v2, %v286_v56 }
 0x1b2   :  { %v325_v6 = vmul.f32 0.5, %v324_v60 }
 0x1b3   :  { %393 = vperm.xlu0 %498, %v375_v63   ;;  %348 = vperm.xlu1 %499, %v334_v5  }
 0x1b4   :  { %v326_v3 = vsub.f32 1.5, %v325_v6 }
 0x1b6   :  { %v327_v7 = vmul.f32 %v510_v55, %v326_v3 }
 0x1b8   :  { %v331_v9 = vsel %vm330_vm13, %v510_v55, %v327_v7 }
 0x1b9   :  { %v335_v10 = vmul.f32 %v331_v9, %v287_v4 }
 0x1bb   :  { %388 = vperm.xlu1 %499, %v374_v8   ;;  %353 = vperm.xlu2 %500, %v335_v10  }
 0x1c3   :  { %383 = vperm.xlu2 %500, %v373_v11  }
 0x1fd   :  { %v339_v12 = vpop.permute.xlu2 %338 }
 0x1fe   :  { %v356_v13 = vmul.f32 %v339_v12, %v674_v23  ;;  %v357_v14 = vmul.f32 %v339_v12, %v677_v24  ;;  %v358_v15 = vmul.f32 %v339_v12, %v679_v25  ;;  %v359_v16 = vmul.f32 %v339_v12, %v681_v26 }
 0x200   :  { %v396_v18 = vadd.f32 %v379_v17, %v356_v13  ;;  %v397_v19 = vadd.f32 %v379_v17, %v357_v14  ;;  %v398_v21 = vadd.f32 %v379_v17, %v358_v15  ;;  %v399_v22 = vadd.f32 %v379_v17, %v359_v16 }
 0x202   :  { %vm412_vm14 = vcmp.ge.f32.partialorder %v396_v18, 0.0  ;;  %vm413_vm15 = vcmp.ge.f32.partialorder %v397_v19, 0.0  ;;  %vm414_vm0 = vcmp.ge.f32.partialorder %v398_v21, 0.0  ;;  %vm415_vm1 = vcmp.ge.f32.partialorder %v399_v22, 0.0 }
 0x203   :  { %v428_v27 = vmul.f32 0.01, %v396_v18  ;;  %v429_v28 = vmul.f32 0.01, %v397_v19  ;;  %v430_v29 = vmul.f32 0.01, %v398_v21 }
 0x204   :  { %v431_v30 = vmul.f32 0.01, %v399_v22 }
 0x205   :  { %v444_v23 = vsel %vm412_vm14, %v396_v18, %v428_v27  ;;  %v445_v31 = vsel %vm413_vm15, %v397_v19, %v429_v28  ;;  %v446_v24 = vsel %vm414_vm0, %v398_v21, %v430_v29 }
 0x206   :  { %v447_v32 = vsel %vm415_vm1, %v399_v22, %v431_v30  ;;  %460 = vst [vmem:[%s842_s5] sm:$0xff] %v444_v23 }
 0x207   :  { %461 = vst [vmem:[%s842_s5 + $0x8] sm:$0xff] %v445_v31 }
 0x208   :  { %462 = vst [vmem:[%s842_s5 + $0x10] sm:$0xff] %v446_v24 }
 0x209   :  { %463 = vst [vmem:[%s842_s5 + $0x18] sm:$0xff] %v447_v32 }
 0x215   :  { %v354_v25 = vpop.permute.xlu2 %353 }
 0x216   :  { %v371_v55 = vmul.f32 %v354_v25, %v738_v1 }
 0x21d   :  { %v344_v26 = vpop.permute.xlu0 %343  ;;  %v384_v41 = vpop.permute.xlu2 %383 }
 0x21e   :  { %v360_v33 = vmul.f32 %v344_v26, %v693_v35  ;;  %v361_v34 = vmul.f32 %v344_v26, %v696_v36  ;;  %v362_v37 = vmul.f32 %v344_v26, %v698_v38  ;;  %v363_v40 = vmul.f32 %v344_v26, %v700_v39 }
 0x21f   :  { %v368_v35 = vmul.f32 %v354_v25, %v731_v61  ;;  %v369_v36 = vmul.f32 %v354_v25, %v734_v62  ;;  %v370_v38 = vmul.f32 %v354_v25, %v736_v0 }
 0x220   :  { %v400_v42 = vadd.f32 %v384_v41, %v360_v33  ;;  %v401_v43 = vadd.f32 %v384_v41, %v361_v34  ;;  %v402_v45 = vadd.f32 %v384_v41, %v362_v37  ;;  %v403_v44 = vadd.f32 %v384_v41, %v363_v40 }
 0x222   :  { %vm416_vm2 = vcmp.ge.f32.partialorder %v400_v42, 0.0  ;;  %vm417_vm3 = vcmp.ge.f32.partialorder %v401_v43, 0.0  ;;  %vm418_vm4 = vcmp.ge.f32.partialorder %v402_v45, 0.0  ;;  %vm419_vm5 = vcmp.ge.f32.partialorder %v403_v44, 0.0 }
 0x223   :  { %v432_v46 = vmul.f32 0.01, %v400_v42  ;;  %v433_v47 = vmul.f32 0.01, %v401_v43  ;;  %v434_v50 = vmul.f32 0.01, %v402_v45 }
 0x224   :  { %v435_v53 = vmul.f32 0.01, %v403_v44 }
 0x225   :  { %v448_v39 = vsel %vm416_vm2, %v400_v42, %v432_v46  ;;  %v449_v54 = vsel %vm417_vm3, %v401_v43, %v433_v47  ;;  %v450_v57 = vsel %vm418_vm4, %v402_v45, %v434_v50  ;;  %v394_v20 = vpop.permute.xlu0 %393  ;;  %v349_v58 = vpop.permute.xlu1 %348 }
 0x226   :  { %v451_v56 = vsel %vm419_vm5, %v403_v44, %v435_v53  ;;  %464 = vst [vmem:[%s842_s5 + $0x20] sm:$0xff] %v448_v39  ;;  %v408_v59 = vadd.f32 %v394_v20, %v368_v35  ;;  %v409_v60 = vadd.f32 %v394_v20, %v369_v36  ;;  %v410_v63 = vadd.f32 %v394_v20, %v370_v38 }
 0x227   :  { %465 = vst [vmem:[%s842_s5 + $0x28] sm:$0xff] %v449_v54  ;;  %v411_v61 = vadd.f32 %v394_v20, %v371_v55  ;;  %v364_v4 = vmul.f32 %v349_v58, %v712_v48  ;;  %v365_v8 = vmul.f32 %v349_v58, %v715_v49  ;;  %v366_v9 = vmul.f32 %v349_v58, %v717_v51 }
 0x228   :  { %466 = vst [vmem:[%s842_s5 + $0x30] sm:$0xff] %v450_v57  ;;  %vm424_vm6 = vcmp.ge.f32.partialorder %v408_v59, 0.0  ;;  %vm425_vm7 = vcmp.ge.f32.partialorder %v409_v60, 0.0  ;;  %vm426_vm8 = vcmp.ge.f32.partialorder %v410_v63, 0.0  ;;  %v440_v62 = vmul.f32 0.01, %v408_v59 }
 0x229   :  { %467 = vst [vmem:[%s842_s5 + $0x38] sm:$0xff] %v451_v56  ;;  %vm427_vm9 = vcmp.ge.f32.partialorder %v411_v61, 0.0  ;;  %v441_v0 = vmul.f32 0.01, %v409_v60  ;;  %v442_v1 = vmul.f32 0.01, %v410_v63  ;;  %v367_v10 = vmul.f32 %v349_v58, %v719_v52 }
 0x22a   :  { %v443_v2 = vmul.f32 0.01, %v411_v61  ;;  %v456_v5 = vsel %vm424_vm6, %v408_v59, %v440_v62 }
 0x22b   :  { %v457_v6 = vsel %vm425_vm7, %v409_v60, %v441_v0  ;;  %v458_v3 = vsel %vm426_vm8, %v410_v63, %v442_v1  ;;  %472 = vst [vmem:[%s842_s5 + $0x60] sm:$0xff] %v456_v5 }
 0x22c   :  { %v459_v7 = vsel %vm427_vm9, %v411_v61, %v443_v2  ;;  %473 = vst [vmem:[%s842_s5 + $0x68] sm:$0xff] %v457_v6 }
 0x22d   :  { %474 = vst [vmem:[%s842_s5 + $0x70] sm:$0xff] %v458_v3  ;;  %v389_v11 = vpop.permute.xlu1 %388 }
 0x22e   :  { %475 = vst [vmem:[%s842_s5 + $0x78] sm:$0xff] %v459_v7  ;;  %v404_v48 = vadd.f32 %v389_v11, %v364_v4  ;;  %v405_v12 = vadd.f32 %v389_v11, %v365_v8  ;;  %v406_v13 = vadd.f32 %v389_v11, %v366_v9  ;;  %v407_v14 = vadd.f32 %v389_v11, %v367_v10 }
 0x230   :  { %vm420_vm10 = vcmp.ge.f32.partialorder %v404_v48, 0.0  ;;  %vm421_vm11 = vcmp.ge.f32.partialorder %v405_v12, 0.0  ;;  %vm422_vm12 = vcmp.ge.f32.partialorder %v406_v13, 0.0  ;;  %vm423_vm13 = vcmp.ge.f32.partialorder %v407_v14, 0.0 }
 0x231   :  { %v436_v49 = vmul.f32 0.01, %v404_v48  ;;  %v437_v51 = vmul.f32 0.01, %v405_v12  ;;  %v438_v52 = vmul.f32 0.01, %v406_v13 }
 0x232   :  { %v439_v15 = vmul.f32 0.01, %v407_v14 }
 0x233   :  { %v452_v16 = vsel %vm420_vm10, %v404_v48, %v436_v49  ;;  %v453_v17 = vsel %vm421_vm11, %v405_v12, %v437_v51  ;;  %v454_v18 = vsel %vm422_vm12, %v406_v13, %v438_v52 }
 0x234   :  { %v455_v19 = vsel %vm423_vm13, %v407_v14, %v439_v15  ;;  %468 = vst [vmem:[%s842_s5 + $0x40] sm:$0xff] %v452_v16 }
 0x235   :  { %469 = vst [vmem:[%s842_s5 + $0x48] sm:$0xff] %v453_v17 }
 0x236   :  { %470 = vst [vmem:[%s842_s5 + $0x50] sm:$0xff] %v454_v18 }
 0x237   :  { %471 = vst [vmem:[%s842_s5 + $0x58] sm:$0xff] %v455_v19 }

</bundles_post_ra>
